<compile_context>
chip_gen: v7x
topology: tpu7x:2x2x1
jax: 0.10.0
libtpu: 0.0.40
codegen_flags: <defaults>
</compile_context>

<pallas_src>
import functools

import jax
import jax.numpy as jnp
from jax import lax
from jax.experimental import pallas as pl
from jax.experimental.pallas import tpu as pltpu

_LANES = 128
_CHUNK = 128  # rows per inner reduction chunk (16 f32 vregs per operand)


def _cdiv(a, b):
    return -(-a // b)


def _round_up(a, b):
    return _cdiv(a, b) * b


def _tpu_vmem_and_cores():
    """Best-effort query of physical VMEM bytes and TensorCore count."""
    vmem = 128 << 20
    cores = 1
    try:
        info = pltpu.get_tpu_info()
        vmem = int(getattr(info, "vmem_capacity_bytes", vmem)) or vmem
        for attr in ("num_cores", "core_count", "num_tensorcores",
                     "tensorcores_per_chip"):
            v = getattr(info, attr, None)
            if v:
                cores = int(v)
                break
    except Exception:
        pass
    return vmem, cores


def _multi_criterion_kernel(x_ref, y_ref, sse_ref, sae_ref, sse_acc, sae_acc,
                            *, tile, chunk, valid_rows, mask_rows, unroll):
    """Accumulate per-shard sum-of-squared-error / sum-of-abs-error.

    Grid = (shard, k).  k is the reduction axis ("arbitrary"); each shard has
    its own scratch + output block.  The tile is reduced in `chunk`-row
    sub-slices so every intermediate stays in vregs; the (8,128) accumulators
    are updated with pure VPU adds, and the single cross-lane reduction
    happens once per shard in the final pl.when block.
    """
    k = pl.program_id(1)

    @pl.when(k == 0)
    def _():
        sse_acc[...] = jnp.zeros_like(sse_acc)
        sae_acc[...] = jnp.zeros_like(sae_acc)

    # Global row offset of this block (tile is a Python int closure constant).
    block_row0 = (pl.program_id(0) * pl.num_programs(1) + k) * tile

    if mask_rows:
        base_iota = lax.broadcasted_iota(jnp.int32, (chunk, _LANES), 0)

    groups = chunk // 8

    def body(c, carry):
        r0 = pl.multiple_of(c * chunk, chunk)
        xs = x_ref[pl.ds(r0, chunk), :].astype(jnp.float32)
        ys = y_ref[pl.ds(r0, chunk), :].astype(jnp.float32)
        d = xs - ys
        if mask_rows:
            # Rows at/after `valid_rows` belong to the partial boundary block
            # (unspecified data) -- zero them before they touch the sums.
            limit = valid_rows - (block_row0 + r0)
            d = jnp.where(base_iota < limit, d, 0.0)
        sq = d * d
        ab = jnp.abs(d)
        sse_acc[...] = sse_acc[...] + jnp.sum(sq.reshape(groups, 8, _LANES), axis=0)
        sae_acc[...] = sae_acc[...] + jnp.sum(ab.reshape(groups, 8, _LANES), axis=0)
        return carry

    lax.fori_loop(0, tile // chunk, body, 0, unroll=unroll)

    @pl.when(k == pl.num_programs(1) - 1)
    def _():
        sse_ref[...] = jnp.full(sse_ref.shape, jnp.sum(sse_acc[...]), jnp.float32)
        sae_ref[...] = jnp.full(sae_ref.shape, jnp.sum(sae_acc[...]), jnp.float32)


def multiple_criterions_forward(crit_inp, gts, *, row_tile=None, num_shards=None):
    """JAX/Pallas equivalent of
    MultipleCriterions(['mse','l1'], [nn.MSELoss(), nn.L1Loss()]).forward(...).

    Returns a dict with 'mse', 'l1' and 'total_loss' (float32 scalars).
    """
    assert crit_inp.shape == gts.shape
    n_elems = int(crit_inp.size)
    assert n_elems > 0

    # Each operand keeps its own dtype (bf16 stays bf16 -> half the HBM
    # traffic); unsupported dtypes are promoted to f32 in the wrapper.
    def _norm(a):
        return a if a.dtype in (jnp.bfloat16, jnp.float32) else a.astype(jnp.float32)

    x = _norm(crit_inp)
    y = _norm(gts)
    isx = jnp.dtype(x.dtype).itemsize
    isy = jnp.dtype(y.dtype).itemsize

    vmem_cap, cores = _tpu_vmem_and_cores()
    rows = _cdiv(n_elems, _LANES)

    # ---- tile geometry (all Python ints) ------------------------------------
    if rows <= _CHUNK:
        # Tiny input: one block; pad to an (8,128)-aligned slab (cheap).
        tile = _round_up(rows, 8)
        chunk = tile
        rows_alloc = tile
        mask_rows = False
    else:
        # Generation-aware budget: keep the double-buffered input blocks to
        # ~1/3 of physical VMEM (64 MiB on v7x, 128 MiB on v5e/v6e), capped.
        cap = min(48 << 20, (vmem_cap * 5) // 8)
        io_budget = min(24 << 20, vmem_cap // 3)
        tile = io_budget // (2 * _LANES * (isx + isy))
        if row_tile is not None:
            tile = int(row_tile)
        tile = max(_CHUNK, (tile // _CHUNK) * _CHUNK)
        # Never exceed the scoped-VMEM cap, and never exceed the array itself.
        max_tile = max(_CHUNK,
                       ((cap - (4 << 20)) // (2 * _LANES * (isx + isy))
                        // _CHUNK) * _CHUNK)
        tile = min(tile, max_tile, (rows // _CHUNK) * _CHUNK)
        chunk = _CHUNK
        rows_alloc = rows                      # pad only the ragged lane tail
        mask_rows = (rows % tile) != 0         # partial boundary block?

    n_blocks = _cdiv(rows_alloc, tile)

    # ---- shard ("parallel") axis: largest divisor of n_blocks ≤ request -----
    if num_shards is None:
        num_shards = cores                     # 1 on v5e/v6e, #TCs on v7x
    ns = max(1, min(int(num_shards), n_blocks))
    while n_blocks % ns:
        ns -= 1
    bps = n_blocks // ns

    # ---- flatten; pad only the final partial 128-lane row (zeros add 0) -----
    pad = rows_alloc * _LANES - n_elems
    xf = x.reshape(-1)
    yf = y.reshape(-1)
    if pad:
        xf = jnp.pad(xf, (0, pad))
        yf = jnp.pad(yf, (0, pad))
    x2d = xf.reshape(rows_alloc, _LANES)
    y2d = yf.reshape(rows_alloc, _LANES)

    # ---- scoped-VMEM limit: only raise when actually needed -----------------
    block_bytes = tile * _LANES * (isx + isy)
    footprint = 2 * block_bytes + (1 << 20)    # double-buffered inputs + slack
    vmem_limit = None
    if footprint > 14 << 20:                   # above the v5e scoped default
        cap = min(48 << 20, (vmem_cap * 5) // 8)
        vmem_limit = min(footprint + (8 << 20), cap)

    kernel = functools.partial(
        _multi_criterion_kernel,
        tile=tile, chunk=chunk, valid_rows=rows, mask_rows=mask_rows,
        unroll=min(8, max(1, tile // chunk)))

    part_shape = jax.ShapeDtypeStruct((ns, 1, 1), jnp.float32)
    in_map = lambda s, k: (s * bps + k, 0)
    out_map = lambda s, k: (s, 0, 0)

    cost = pl.CostEstimate(flops=5 * n_elems, transcendentals=0,
                           bytes_accessed=n_elems * (isx + isy) + 8 * ns)

    sse_parts, sae_parts = pl.pallas_call(
        kernel,
        out_shape=(part_shape, part_shape),
        grid_spec=pltpu.PrefetchScalarGridSpec(
            num_scalar_prefetch=0,
            grid=(ns, bps),
            in_specs=[
                pl.BlockSpec((tile, _LANES), in_map),
                pl.BlockSpec((tile, _LANES), in_map),
            ],
            out_specs=[
                pl.BlockSpec((1, 1, 1), out_map),
                pl.BlockSpec((1, 1, 1), out_map),
            ],
            scratch_shapes=[
                pltpu.VMEM((8, _LANES), jnp.float32),  # running sum of squares
                pltpu.VMEM((8, _LANES), jnp.float32),  # running sum of |d|
            ],
        ),
        # TODO(synk): on v7x, pltpu.CORE_PARALLEL on the shard axis (or
        # pl.core_map over a tensorcore mesh) is needed to actually stream on
        # both TensorCores; plain "parallel" is kept here for portability.
        compiler_params=pltpu.CompilerParams(
            dimension_semantics=("parallel", "arbitrary"),
            vmem_limit_bytes=vmem_limit),
        cost_estimate=cost,
    )(x2d, y2d)

    inv_n = jnp.float32(1.0 / n_elems)
    mse = jnp.sum(sse_parts) * inv_n      # nn.MSELoss(reduction='mean')
    l1 = jnp.sum(sae_parts) * inv_n       # nn.L1Loss(reduction='mean')

    # Mimic the module's loss dict (names=['mse', 'l1']).
    return {"mse": mse, "l1": l1, "total_loss": mse + l1}


def _reference(crit_inp, gts):
    d = crit_inp.astype(jnp.float32) - gts.astype(jnp.float32)
    mse = jnp.mean(d * d)
    l1 = jnp.mean(jnp.abs(d))
    return {"mse": mse, "l1": l1, "total_loss": mse + l1}


if __name__ == "__main__":
    key = jax.random.PRNGKey(0)
    k1, k2, k3, k4, k5, k6 = jax.random.split(key, 6)

    # Test 1: small NCHW (batch=2, channels=4, spatial=16x16), lane-aligned.
    x1 = jax.random.normal(k1, (2, 4, 16, 16), dtype=jnp.float32)
    y1 = jax.random.normal(k2, (2, 4, 16, 16), dtype=jnp.float32)
    loss1 = multiple_criterions_forward(x1, y1)
    loss1 = jax.tree_util.tree_map(jax.block_until_ready, loss1)
    ref1 = _reference(x1, y1)
    for name in ("mse", "l1", "total_loss"):
        assert jnp.allclose(loss1[name], ref1[name], rtol=1e-5, atol=1e-6), name

    # Test 2: ragged element count (not a multiple of 128).
    x2 = jax.random.normal(k3, (3, 5, 17, 19), dtype=jnp.float32)
    y2 = jax.random.normal(k4, (3, 5, 17, 19), dtype=jnp.float32)
    loss2 = multiple_criterions_forward(x2, y2)
    loss2 = jax.tree_util.tree_map(jax.block_until_ready, loss2)
    ref2 = _reference(x2, y2)
    for name in ("mse", "l1", "total_loss"):
        assert jnp.allclose(loss2[name], ref2[name], rtol=1e-5, atol=1e-6), name

    # Test 3: larger input exercising in-kernel boundary-block masking, the
    # shard axis, and mixed bf16/f32 operands (no host-side pad: 115200 % 128 == 0).
    x3 = jax.random.normal(k5, (3, 300, 128), dtype=jnp.float32).astype(jnp.bfloat16)
    y3 = jax.random.normal(k6, (3, 300, 128), dtype=jnp.float32)
    loss3 = multiple_criterions_forward(x3, y3, row_tile=256, num_shards=2)
    loss3 = jax.tree_util.tree_map(jax.block_until_ready, loss3)
    ref3 = _reference(x3, y3)
    for name in ("mse", "l1", "total_loss"):
        assert jnp.allclose(loss3[name], ref3[name], rtol=1e-4, atol=1e-5), name

    print("KERNEL_OK")
</pallas_src>

<mosaic_0001>
module attributes {stable_mosaic.version = 11 : i64} {
  func.func @_multi_criterion_kernel(%arg0: i32, %arg1: i32, %arg2: memref<16x128xf32, #tpu.memory_space<vmem>>, %arg3: memref<16x128xf32, #tpu.memory_space<vmem>>, %arg4: memref<1x1x1xf32, #tpu.memory_space<vmem>>, %arg5: memref<1x1x1xf32, #tpu.memory_space<vmem>>, %arg6: memref<8x128xf32, #tpu.memory_space<vmem>>, %arg7: memref<8x128xf32, #tpu.memory_space<vmem>>) attributes {dimension_semantics = [#tpu.dimension_semantics<parallel>, #tpu.dimension_semantics<arbitrary>], iteration_bounds = array<i64: 1, 1>, scalar_prefetch = 0 : i64, scratch_operands = 2 : i64, tpu.core_type = #tpu.core_type<tc>, window_params = [{transform_indices = @transform_0, window_bounds = array<i64: 16, 128>}, {transform_indices = @transform_1, window_bounds = array<i64: 16, 128>}, {transform_indices = @transform_2, window_bounds = array<i64: 1, 1, 1>}, {transform_indices = @transform_3, window_bounds = array<i64: 1, 1, 1>}]} {
    %c0_i32 = arith.constant 0 : i32
    %0 = arith.cmpi eq, %arg1, %c0_i32 : i32
    %1 = arith.extui %0 : i1 to i32
    %c0_i32_0 = arith.constant 0 : i32
    %2 = arith.cmpi ne, %1, %c0_i32_0 : i32
    scf.if %2 {
      %cst_14 = arith.constant 0.000000e+00 : f32
      %25 = vector.broadcast %cst_14 : f32 to vector<8x128xf32>
      %c0_15 = arith.constant 0 : index
      %c0_16 = arith.constant 0 : index
      %26 = vector.load %arg6[%c0_15, %c0_16] : memref<8x128xf32, #tpu.memory_space<vmem>>, vector<8x128xf32>
      tpu.vector_store %arg6[%c0_15, %c0_16], %25 {strides = array<i32>} : memref<8x128xf32, #tpu.memory_space<vmem>>, vector<8x128xf32>,
      %cst_17 = arith.constant 0.000000e+00 : f32
      %27 = vector.broadcast %cst_17 : f32 to vector<8x128xf32>
      %c0_18 = arith.constant 0 : index
      %c0_19 = arith.constant 0 : index
      %28 = vector.load %arg7[%c0_18, %c0_19] : memref<8x128xf32, #tpu.memory_space<vmem>>, vector<8x128xf32>
      tpu.vector_store %arg7[%c0_18, %c0_19], %27 {strides = array<i32>} : memref<8x128xf32, #tpu.memory_space<vmem>>, vector<8x128xf32>,
    } else {
    }
    %c0_i32_1 = arith.constant 0 : i32
    %c16_i32 = arith.constant 16 : i32
    %3 = arith.muli %c0_i32_1, %c16_i32 : i32
    %4 = tpu.assume_multiple %3, 16 : i32
    %5 = arith.index_cast %4 : i32 to index
    %c0 = arith.constant 0 : index
    %6 = vector.load %arg2[%5, %c0] : memref<16x128xf32, #tpu.memory_space<vmem>>, vector<16x128xf32>
    %7 = arith.index_cast %4 : i32 to index
    %c0_2 = arith.constant 0 : index
    %8 = vector.load %arg3[%7, %c0_2] : memref<16x128xf32, #tpu.memory_space<vmem>>, vector<16x128xf32>
    %9 = arith.subf %6, %8 : vector<16x128xf32>
    %10 = arith.mulf %9, %9 : vector<16x128xf32>
    %11 = math.absf %9 : vector<16x128xf32>
    %c0_3 = arith.constant 0 : index
    %c0_4 = arith.constant 0 : index
    %12 = vector.load %arg6[%c0_3, %c0_4] : memref<8x128xf32, #tpu.memory_space<vmem>>, vector<8x128xf32>
    %13 = vector.shape_cast %10 : vector<16x128xf32> to vector<2x8x128xf32>
    %cst = arith.constant dense<0.000000e+00> : vector<8x128xf32>
    %14 = vector.multi_reduction <add>, %13, %cst [0] : vector<2x8x128xf32> to vector<8x128xf32>
    %15 = arith.addf %12, %14 : vector<8x128xf32>
    %c0_5 = arith.constant 0 : index
    %c0_6 = arith.constant 0 : index
    %16 = vector.load %arg6[%c0_5, %c0_6] : memref<8x128xf32, #tpu.memory_space<vmem>>, vector<8x128xf32>
    tpu.vector_store %arg6[%c0_5, %c0_6], %15 {strides = array<i32>} : memref<8x128xf32, #tpu.memory_space<vmem>>, vector<8x128xf32>,
    %c0_7 = arith.constant 0 : index
    %c0_8 = arith.constant 0 : index
    %17 = vector.load %arg7[%c0_7, %c0_8] : memref<8x128xf32, #tpu.memory_space<vmem>>, vector<8x128xf32>
    %18 = vector.shape_cast %11 : vector<16x128xf32> to vector<2x8x128xf32>
    %cst_9 = arith.constant dense<0.000000e+00> : vector<8x128xf32>
    %19 = vector.multi_reduction <add>, %18, %cst_9 [0] : vector<2x8x128xf32> to vector<8x128xf32>
    %20 = arith.addf %17, %19 : vector<8x128xf32>
    %c0_10 = arith.constant 0 : index
    %c0_11 = arith.constant 0 : index
    %21 = vector.load %arg7[%c0_10, %c0_11] : memref<8x128xf32, #tpu.memory_space<vmem>>, vector<8x128xf32>
    tpu.vector_store %arg7[%c0_10, %c0_11], %20 {strides = array<i32>} : memref<8x128xf32, #tpu.memory_space<vmem>>, vector<8x128xf32>,
    %c1_i32 = arith.constant 1 : i32
    %c0_i32_12 = arith.constant 0 : i32
    %22 = arith.cmpi eq, %arg1, %c0_i32_12 : i32
    %23 = arith.extui %22 : i1 to i32
    %c0_i32_13 = arith.constant 0 : i32
    %24 = arith.cmpi ne, %23, %c0_i32_13 : i32
    scf.if %24 {
      %c0_14 = arith.constant 0 : index
      %c0_15 = arith.constant 0 : index
      %25 = vector.load %arg6[%c0_14, %c0_15] : memref<8x128xf32, #tpu.memory_space<vmem>>, vector<8x128xf32>
      %26 = vector.shape_cast %25 : vector<8x128xf32> to vector<1x8x128xf32>
      %cst_16 = arith.constant dense<0.000000e+00> : vector<1xf32>
      %27 = vector.multi_reduction <add>, %26, %cst_16 [1, 2] : vector<1x8x128xf32> to vector<1xf32>
      %28 = vector.shape_cast %27 : vector<1xf32> to vector<1x1x1xf32>
      %29 = vector.extract %28[0, 0, 0] : f32 from vector<1x1x1xf32>
      %30 = vector.broadcast %29 : f32 to vector<1x1x1xf32>
      %c0_17 = arith.constant 0 : index
      %c0_18 = arith.constant 0 : index
      %c0_19 = arith.constant 0 : index
      %31 = vector.load %arg4[%c0_17, %c0_18, %c0_19] : memref<1x1x1xf32, #tpu.memory_space<vmem>>, vector<1x1x1xf32>
      tpu.vector_store %arg4[%c0_17, %c0_18, %c0_19], %30 {strides = array<i32>} : memref<1x1x1xf32, #tpu.memory_space<vmem>>, vector<1x1x1xf32>,
      %c0_20 = arith.constant 0 : index
      %c0_21 = arith.constant 0 : index
      %32 = vector.load %arg7[%c0_20, %c0_21] : memref<8x128xf32, #tpu.memory_space<vmem>>, vector<8x128xf32>
      %33 = vector.shape_cast %32 : vector<8x128xf32> to vector<1x8x128xf32>
      %cst_22 = arith.constant dense<0.000000e+00> : vector<1xf32>
      %34 = vector.multi_reduction <add>, %33, %cst_22 [1, 2] : vector<1x8x128xf32> to vector<1xf32>
      %35 = vector.shape_cast %34 : vector<1xf32> to vector<1x1x1xf32>
      %36 = vector.extract %35[0, 0, 0] : f32 from vector<1x1x1xf32>
      %37 = vector.broadcast %36 : f32 to vector<1x1x1xf32>
      %c0_23 = arith.constant 0 : index
      %c0_24 = arith.constant 0 : index
      %c0_25 = arith.constant 0 : index
      %38 = vector.load %arg5[%c0_23, %c0_24, %c0_25] : memref<1x1x1xf32, #tpu.memory_space<vmem>>, vector<1x1x1xf32>
      tpu.vector_store %arg5[%c0_23, %c0_24, %c0_25], %37 {strides = array<i32>} : memref<1x1x1xf32, #tpu.memory_space<vmem>>, vector<1x1x1xf32>,
    } else {
    }
    return
  }
  func.func @transform_0(%arg0: i32, %arg1: i32) -> (i32, i32) {
    %c1_i32 = arith.constant 1 : i32
    %0 = arith.muli %arg0, %c1_i32 : i32
    %1 = arith.addi %0, %arg1 : i32
    %c0_i32 = arith.constant 0 : i32
    %c0_i32_0 = arith.constant 0 : i32
    return %1, %c0_i32 : i32, i32
  }
  func.func @transform_1(%arg0: i32, %arg1: i32) -> (i32, i32) {
    %c1_i32 = arith.constant 1 : i32
    %0 = arith.muli %arg0, %c1_i32 : i32
    %1 = arith.addi %0, %arg1 : i32
    %c0_i32 = arith.constant 0 : i32
    %c0_i32_0 = arith.constant 0 : i32
    return %1, %c0_i32 : i32, i32
  }
  func.func @transform_2(%arg0: i32, %arg1: i32) -> (i32, i32, i32) {
    %c0_i32 = arith.constant 0 : i32
    %c0_i32_0 = arith.constant 0 : i32
    %c0_i32_1 = arith.constant 0 : i32
    return %arg0, %c0_i32, %c0_i32_0 : i32, i32, i32
  }
  func.func @transform_3(%arg0: i32, %arg1: i32) -> (i32, i32, i32) {
    %c0_i32 = arith.constant 0 : i32
    %c0_i32_0 = arith.constant 0 : i32
    %c0_i32_1 = arith.constant 0 : i32
    return %arg0, %c0_i32, %c0_i32_0 : i32, i32, i32
  }
}

</mosaic_0001>

<bundles_post_ra>
// kernel: tpu_custom_call.1
= control target key start
LH: loop header
LB: loop body
LE: loop exit
PB: predicated region body
PF: predicated region fallthrough
CT: control target
= control target key end

     0   :  { %9 = vsyncpa [#allocation5], 0  ;;  %s319_s0 = inlined_call_operand.hbm [shape: f32[16,128], index: 0, kind: input, shape index: {}]   ;;  %s320_s1 = inlined_call_operand.hbm [shape: f32[16,128], index: 1, kind: input, shape index: {}]   ;;  %s321_s2 = inlined_call_operand.hbm [shape: f32[1,1,1], index: 2, kind: output, shape index: {0}]   ;;  %s322_s3 = inlined_call_operand.hbm [shape: f32[1,1,1], index: 3, kind: output, shape index: {1}]  }
   0x1   :  { %10 = vsyncpa [#allocation8], 0 }
   0x2   :  { %11 = vsyncpa [#allocation6], 0 }
   0x3   :  { %12 = vsyncpa [#allocation11], 0  ;;  %s243_s12 = smov [#allocation4]   ;;  %s147_s16 = scalar_lea.hbm %s319_s0, 256 }
   0x4   :  { %s22_s13 = sshll.u32 %s243_s12, 4  ;;  %p148_p0 = scmp.ne.s32.totalorder %s319_s0, %s147_s16  ;;  %s23_s13 = int_to_ptr.vmem [resolvable:$true] %s22_s13 }
   0x5   :  { %p151_p1 = scmp.lt.u32.totalorder %s147_s16, %s319_s0 }
   0x7   :  { %p153_p2 = pnand %p151_p1, %p148_p0 }
   0x9   :  { %156 = shalt.err (!%p153_p2)
}
   0xa   :  { %s157_s21 = scalar_lea.vmem %s23_s13, 256  ;;  %p162_p4 = scmp.lt.s32.totalorder %s23_s13, %s23_s13 }
   0xb   :  { %p158_p3 = scmp.ne.s32.totalorder %s23_s13, %s157_s21  ;;  %p163_p5 = scmp.lt.s32.totalorder %s157_s21, %s157_s21 }
   0xd   :  { %p164_p6 = por %p163_p5, %p162_p4 }
   0xf   :  { %p165_p7 = pnand %p164_p6, %p158_p3 }
  0x11   :  { %168 = shalt.err (!%p165_p7)
}
  0x12   :  { %s244_s22 = smov 128   ;;  %s245_s23 = smov 8  }
  0x13   :  { %28 = dma.hbm_to_vmem [thread:$0]  %s319_s0, 256, %s23_s13, [#allocation5], %s244_s22, %s244_s22, %s245_s23  }
  0x14   :  { %s246_s26 = smov [#allocation7]   ;;  %s169_s30 = scalar_lea.hbm %s320_s1, 256 }
  0x15   :  { %s38_s27 = sshll.u32 %s246_s26, 4  ;;  %p170_p8 = scmp.ne.s32.totalorder %s320_s1, %s169_s30  ;;  %s39_s27 = int_to_ptr.vmem [resolvable:$true] %s38_s27 }
  0x16   :  { %p173_p9 = scmp.lt.u32.totalorder %s169_s30, %s320_s1 }
  0x18   :  { %p175_p10 = pnand %p173_p9, %p170_p8 }
  0x1a   :  { %178 = shalt.err (!%p175_p10)
}
  0x1b   :  { %s179_s8 = scalar_lea.vmem %s39_s27, 256  ;;  %p184_p12 = scmp.lt.s32.totalorder %s39_s27, %s39_s27 }
  0x1c   :  { %p180_p11 = scmp.ne.s32.totalorder %s39_s27, %s179_s8  ;;  %p185_p13 = scmp.lt.s32.totalorder %s179_s8, %s179_s8 }
  0x1e   :  { %p186_p0 = por %p185_p13, %p184_p12 }
  0x20   :  { %p187_p1 = pnand %p186_p0, %p180_p11 }
  0x22   :  { %190 = shalt.err (!%p187_p1)
}
  0x23   :  { %44 = dma.hbm_to_vmem [thread:$0]  %s320_s1, 256, %s39_s27, [#allocation8], %s244_s22, %s244_s22, %s245_s23  }
  0x24   :  { %235 = dma.done.wait [#allocation5], 256  }
  0x25   :  { %236 = vsyncadd [#allocation5], 4294967040 }
  0x26   :  { %237 = dma.done.wait [#allocation8], 256  }
  0x27   :  { %238 = vsyncadd [#allocation8], 4294967040  ;;  %v61_v0 = vld [vmem:[#allocation4] sm:$0xff]  ;;  %v62_v1 = vld [vmem:[#allocation4 + $0x8] sm:$0xff]  ;;  %s247_s1 = smov [#allocation9]   ;;  %vm93_vm0 = vcmask 0  }
  0x28   :  { %v63_v2 = vld [vmem:[#allocation7] sm:$0xff]  ;;  %v64_v3 = vld [vmem:[#allocation7 + $0x8] sm:$0xff]  ;;  %s113_s10 = sshll.u32 %s247_s1, 4  ;;  %s248_s12 = smov [#allocation10]   ;;  %s114_s10 = int_to_ptr.vmem [resolvable:$true] %s113_s10 }
  0x29   :  { %v65_v4 = vsub.f32 %v61_v0, %v63_v2  ;;  %v66_v5 = vsub.f32 %v62_v1, %v64_v3  ;;  %s123_s13 = sshll.u32 %s248_s12, 4  ;;  %s191_s14 = scalar_lea.vmem %s114_s10, 16  ;;  %s124_s13 = int_to_ptr.vmem [resolvable:$true] %s123_s13 }
  0x2a   :  { %p192_p2 = scmp.ne.s32.totalorder %s114_s10, %s191_s14  ;;  %s195_s15 = scalar_lea.vmem %s114_s10, 32 }
  0x2b   :  { %v67_v6 = vmul.f32 %v65_v4, %v65_v4  ;;  %v68_v7 = vmul.f32 %v66_v5, %v66_v5  ;;  %v69_v8 = vand.u32 2147483647, %v65_v4  ;;  %v70_v9 = vand.u32 2147483647, %v66_v5  ;;  %p196_p3 = scmp.lt.s32.totalorder %s114_s10, %s114_s10  ;;  %p197_p4 = scmp.lt.s32.totalorder %s195_s15, %s191_s14 }
  0x2d   :  { %v72_v10 = vadd.f32 %v68_v7, %v67_v6  ;;  %v76_v11 = vadd.f32 %v70_v9, %v69_v8  ;;  %p198_p5 = por %p197_p4, %p196_p3 }
  0x2f   :  { %83 = vadd.xlane.f32.xlu0 %v72_v10  ;;  %p199_p6 = pnand %p198_p5, %p192_p2 }
  0x33   :  { %96 = vadd.xlane.f32.xlu0 %v76_v11 }
  0xbc   :  { %v84_v12 = vpop.xlane.xlu0 %83 }
  0xbd   :  { %v85_v13 = vrot.slane %v84_v12, 4 }
  0xbf   :  { %v86_v14 = vadd.f32 %v85_v13, %v84_v12 }
  0xc0   :  { %v97_v15 = vpop.xlane.xlu0 %96 }
  0xc1   :  { %v87_v16 = vrot.slane %v86_v14, 2  ;;  %v98_v17 = vrot.slane %v97_v15, 4 }
  0xc3   :  { %v99_v18 = vadd.f32 %v98_v17, %v97_v15  ;;  %v88_v19 = vadd.f32 %v87_v16, %v86_v14 }
  0xc5   :  { %v100_v20 = vrot.slane %v99_v18, 2  ;;  %v89_v21 = vrot.slane %v88_v19, 1 }
  0xc7   :  { %v101_v22 = vadd.f32 %v100_v20, %v99_v18  ;;  %v90_v23 = vadd.f32 %v89_v21, %v88_v19 }
  0xc9   :  { %137 = vpush %v90_v23  ;;  %v102_v24 = vrot.slane %v101_v22, 1 }
  0xcb   :  { %v103_v25 = vadd.f32 %v102_v24, %v101_v22 }
  0xcd   :  { %139 = vpush %v103_v25 }
  0xfa   :  { %s138_s11 = spop %137 }
  0xfb   :  { %v92_v26 = vstv %s138_s11 }
  0xfc   :  { %94 = vst.msk [vmem:[#allocation9] sm:$0x1] %vm93_vm0, %v92_v26 }
  0xfd   :  { %202 = shalt.err (!%p199_p6)
}
  0xfe   :  { %s203_s18 = scalar_lea.hbm %s321_s2, 16 }
  0xff   :  { %p204_p7 = scmp.ne.s32.totalorder %s321_s2, %s203_s18  ;;  %p207_p8 = scmp.lt.u32.totalorder %s203_s18, %s321_s2 }
 0x101   :  { %p209_p9 = pnand %p207_p8, %p204_p7 }
 0x103   :  { %212 = shalt.err (!%p209_p9)
}
 0x104   :  { %116 = dma.vmem_to_hbm [thread:$0]  %s114_s10, 16, %s321_s2, [#allocation6]  }
 0x105   :  { %s140_s25 = spop %139  ;;  %s213_s26 = scalar_lea.vmem %s124_s13, 16 }
 0x106   :  { %v105_v27 = vstv %s140_s25  ;;  %p214_p10 = scmp.ne.s32.totalorder %s124_s13, %s213_s26  ;;  %s217_s27 = scalar_lea.vmem %s124_s13, 32 }
 0x107   :  { %106 = vst.msk [vmem:[#allocation10] sm:$0x1] %vm93_vm0, %v105_v27  ;;  %p218_p11 = scmp.lt.s32.totalorder %s124_s13, %s124_s13  ;;  %p219_p12 = scmp.lt.s32.totalorder %s217_s27, %s213_s26 }
 0x109   :  { %p220_p13 = por %p219_p12, %p218_p11 }
 0x10b   :  { %p221_p0 = pnand %p220_p13, %p214_p10 }
 0x10d   :  { %224 = shalt.err (!%p221_p0)
}
 0x10e   :  { %s225_s30 = scalar_lea.hbm %s322_s3, 16 }
 0x10f   :  { %p226_p1 = scmp.ne.s32.totalorder %s322_s3, %s225_s30  ;;  %p229_p2 = scmp.lt.u32.totalorder %s225_s30, %s322_s3 }
 0x111   :  { %p231_p3 = pnand %p229_p2, %p226_p1 }
 0x113   :  { %234 = shalt.err (!%p231_p3)
}
 0x114   :  { %126 = dma.vmem_to_hbm [thread:$0]  %s124_s13, 16, %s322_s3, [#allocation11]  }
 0x115   :  { %239 = dma.done.wait [#allocation6], 16  }
 0x116   :  { %240 = vsyncadd [#allocation6], 4294967280 }
 0x117   :  { %241 = dma.done.wait [#allocation11], 16  }
 0x118   :  { %242 = vsyncadd [#allocation11], 4294967280 }
 0x119   :  { %133 = vsyncpa [#allocation5], 1 }
 0x11a   :  { %134 = vsyncpa [#allocation8], 1 }
 0x11b   :  { %135 = vsyncpa [#allocation6], 1 }
 0x11c   :  { %136 = vsyncpa [#allocation11], 1 }

</bundles_post_ra>
